<compile_context>
chip_gen: v5e
topology: v5e:2x2
jax: 0.10.0
libtpu: 0.0.40
codegen_flags: <defaults>
</compile_context>

<pallas_src>
import functools

import jax
import jax.numpy as jnp
from jax.experimental import pallas as pl
from jax.experimental.pallas import tpu as pltpu

WCOLS = 128  # lane-padded width of every packed weight column block / bias row / output


# --------------------------------------------------------------------------- kernel
def fused_tcn_kernel(x_ref, w_ref, b_ref, mask_ref, o_ref, *, meta):
    """Whole TCNClassifier forward (both TCN blocks + mean-pool + FC) in one call.

    x_ref:    (B*L, CMAX)        f32  activations, channels zero-padded to CMAX lanes
    w_ref:    (n_w, CMAX, 128)   bf16 packed matmul weights (conv taps, fused ds, fc)
    b_ref:    (n_b, 128)         f32  packed bias rows
    mask_ref: (n_shift, B*L, 1)  f32  causal masks: 1.0 where (row % L) >= shift
    o_ref:    (B, 128)           f32  lane-padded logits (cols >= num_classes are 0)
    """
    L = meta["seq_len"]
    B = meta["batch"]
    BL = B * L
    shift_col = meta["shift_col"]

    def conv(h, w_start, b_idx, kernel_size, dilation, out_width):
        # Causal dilated conv as K accumulating per-tap matmuls (bf16 in, f32 acc).
        c_rows = h.shape[1]
        acc = None
        for m in range(kernel_size):
            shift = m * dilation
            if shift == 0:
                src = h
            else:
                # rolled[r] = h[(r - shift) mod BL]; rows with (r mod L) < shift are
                # the causal zero padding (and exactly the rows where the roll
                # wrapped across a sequence boundary), so the precomputed mask
                # zeroes them.
                rolled = pltpu.roll(h, shift=shift, axis=0)
                src = rolled * mask_ref[shift_col[shift]]
            part = jnp.dot(src.astype(jnp.bfloat16),
                           w_ref[w_start + m, 0:c_rows, 0:out_width],
                           preferred_element_type=jnp.float32)
            acc = part if acc is None else acc + part
        return acc + b_ref[b_idx:b_idx + 1, 0:out_width]

    h = x_ref[...]                                            # (BL, CMAX) f32

    for blk in meta["blocks"]:
        K, d, c_out = blk["kernel_size"], blk["dilation"], blk["c_out"]
        if blk["has_downsample"]:
            # conv1 and the 1x1 downsample share one 128-lane matmul:
            # cols [0, c_out) = conv output, cols [c_out, 2*c_out) = residual branch.
            z = conv(h, blk["w1"], blk["b1"], K, d, 2 * c_out)
            out = jnp.maximum(z[:, :c_out], 0.0)              # ReLU (dropout = id)
            res = z[:, c_out:2 * c_out]
        else:
            out = jnp.maximum(conv(h, blk["w1"], blk["b1"], K, d, c_out), 0.0)
            res = h[:, :c_out]
        out = jnp.maximum(conv(out, blk["w2"], blk["b2"], K, d, c_out), 0.0)
        h = jnp.maximum(out + res, 0.0)                       # (BL, c_out)

    # --- head: mean over time as an MXU matmul, then lane-padded FC (kept f32) ----
    c_last = meta["c_last"]
    rows = jax.lax.broadcasted_iota(jnp.int32, (B, BL), 1)
    starts = jax.lax.broadcasted_iota(jnp.int32, (B, BL), 0) * L
    pool = jnp.where((rows >= starts) & (rows < starts + L), 1.0 / L, 0.0)  # (B, BL)
    pooled = jnp.dot(pool, h, preferred_element_type=jnp.float32)          # (B, c_last)
    wfc = w_ref[meta["w_fc"], 0:c_last, :].astype(jnp.float32)             # (c_last, 128)
    logits = jnp.dot(pooled, wfc, preferred_element_type=jnp.float32)
    o_ref[...] = logits + b_ref[meta["b_fc"]:meta["b_fc"] + 1, :]


# --------------------------------------------------------------------------- wrapper
def tcn_classifier_forward(x, wslab, bslab, maskslab, meta):
    """x: (B, L, input_dim) f32 -> logits (B, num_classes) f32."""
    B, L, c_in = x.shape
    cmax = meta["cmax"]
    # Fold batch into the row (sublane) axis; zero-pad channels to CMAX lanes.
    x2d = jnp.pad(x, ((0, 0), (0, 0), (0, cmax - c_in))).reshape(B * L, cmax)

    kern = functools.partial(fused_tcn_kernel, meta=meta)
    vmem = pl.BlockSpec(memory_space=pltpu.MemorySpace.VMEM)
    # NOTE: single-TensorCore, grid-less invocation. At B*L = 32 the kernel is
    # latency bound and the MXU rows are 4-8x under-filled; for real throughput,
    # batch many sequences per call (M >= 128 rows) and only then add a 'parallel'
    # M-chunk grid axis (which would also let v7x use its second core).
    out = pl.pallas_call(
        kern,
        out_shape=jax.ShapeDtypeStruct((B, WCOLS), jnp.float32),
        in_specs=[vmem, vmem, vmem, vmem],
        out_specs=vmem,
    )(x2d, wslab, bslab, maskslab)
    return out[:, :meta["num_classes"]]


# --------------------------------------------------------------------------- one-time param preprocessing
def preprocess_params(params, *, batch, seq_len):
    """Hoisted layout work: pack every matmul weight (tap-split, time-reversed,
    transposed, zero-padded, bf16) into one slab, all biases into one f32 slab, and
    precompute the causal masks for every distinct (tap * dilation) shift."""
    blocks = params["blocks"]

    cmax = 16
    for blk in blocks:
        c_out, c_in, _ = blk["w1"].shape
        cmax = max(cmax, c_in, c_out)
    cmax = -(-cmax // 16) * 16                       # multiple of 16 (bf16 sublanes)

    w_mats, b_rows, blocks_meta = [], [], []
    for blk in blocks:
        w1, b1, w2, b2 = blk["w1"], blk["b1"], blk["w2"], blk["b2"]
        c_out, c_in, K = w1.shape
        d = int(blk["dilation"])
        has_ds = bool(blk["has_downsample"])
        assert c_out <= WCOLS and (not has_ds or 2 * c_out <= WCOLS)

        # conv1 taps (tap m multiplies x[t - m*d] => PyTorch weight index K-1-m),
        # with the 1x1 downsample fused into tap 0's extra output columns.
        w_start1 = len(w_mats)
        for m in range(K):
            tap = jnp.zeros((cmax, WCOLS), jnp.float32)
            tap = tap.at[:c_in, :c_out].set(w1[:, :, K - 1 - m].T)
            if has_ds and m == 0:
                tap = tap.at[:c_in, c_out:2 * c_out].set(blk["wd"])
            w_mats.append(tap)
        b_idx1 = len(b_rows)
        row = jnp.zeros((WCOLS,), jnp.float32).at[:c_out].set(b1)
        if has_ds:
            row = row.at[c_out:2 * c_out].set(blk["bd"])
        b_rows.append(row)

        # conv2 taps
        w_start2 = len(w_mats)
        for m in range(K):
            tap = jnp.zeros((cmax, WCOLS), jnp.float32)
            tap = tap.at[:c_out, :c_out].set(w2[:, :, K - 1 - m].T)
            w_mats.append(tap)
        b_idx2 = len(b_rows)
        b_rows.append(jnp.zeros((WCOLS,), jnp.float32).at[:c_out].set(b2))

        blocks_meta.append(dict(kernel_size=int(K), dilation=d,
                                has_downsample=has_ds, c_out=int(c_out),
                                w1=w_start1, b1=b_idx1, w2=w_start2, b2=b_idx2))

    # FC head (zero-padded to 128 output lanes -> lane-dense store in the kernel)
    fc_w, fc_b = params["fc_w"], params["fc_b"]       # (num_classes, C), (num_classes,)
    num_classes, c_last = fc_w.shape
    w_fc = len(w_mats)
    w_mats.append(jnp.zeros((cmax, WCOLS), jnp.float32)
                  .at[:c_last, :num_classes].set(fc_w.T))
    b_fc = len(b_rows)
    b_rows.append(jnp.zeros((WCOLS,), jnp.float32).at[:num_classes].set(fc_b))

    wslab = jnp.stack(w_mats).astype(jnp.bfloat16)    # (n_w, cmax, 128) bf16
    bslab = jnp.stack(b_rows)                         # (n_b, 128)       f32

    # Causal masks: one (B*L, 1) column per distinct nonzero shift m*dilation.
    shifts = sorted({m * blk["dilation"] for blk in blocks
                     for m in range(1, blk["kernel_size"])})
    if not shifts:
        shifts = [0]
    t = jnp.arange(batch * seq_len, dtype=jnp.int32) % seq_len
    maskslab = jnp.stack([(t >= s).astype(jnp.float32)[:, None] for s in shifts],
                         axis=0)                      # (n_shift, B*L, 1) f32
    shift_col = {int(s): i for i, s in enumerate(shifts)}

    meta = dict(blocks=blocks_meta, w_fc=w_fc, b_fc=b_fc,
                num_classes=int(num_classes), c_last=int(c_last),
                batch=int(batch), seq_len=int(seq_len), cmax=int(cmax),
                shift_col=shift_col)
    return wslab, bslab, maskslab, meta


# --------------------------------------------------------------------------- reference (pure JAX f32, PyTorch semantics)
def _ref_causal_conv(x_blc, w_oik, b, d):
    B, L, Cin = x_blc.shape
    Cout, _, K = w_oik.shape
    pad = (K - 1) * d
    xp = jnp.pad(x_blc, ((0, 0), (pad, 0), (0, 0)))
    y = jnp.zeros((B, L, Cout), jnp.float32)
    for j in range(K):
        y = y + jnp.einsum("blc,oc->blo", xp[:, j * d: j * d + L, :], w_oik[:, :, j])
    return y + b


def ref_forward(x, params):
    h = x
    for blk in params["blocks"]:
        d = blk["dilation"]
        out = jnp.maximum(_ref_causal_conv(h, blk["w1"], blk["b1"], d), 0.0)
        out = jnp.maximum(_ref_causal_conv(out, blk["w2"], blk["b2"], d), 0.0)
        if blk["has_downsample"]:
            res = jnp.einsum("blc,co->blo", h, blk["wd"]) + blk["bd"]
        else:
            res = h
        h = jnp.maximum(out + res, 0.0)
    m = jnp.mean(h, axis=1)
    return m @ params["fc_w"].T + params["fc_b"]


# --------------------------------------------------------------------------- param construction
def make_params(key, input_dim, num_classes, num_channels, kernel_size):
    blocks = []
    in_ch = input_dim
    for i, out_ch in enumerate(num_channels):
        keys = jax.random.split(jax.random.fold_in(key, i), 6)
        has_ds = in_ch != out_ch
        blocks.append(dict(
            # PyTorch Conv1d layouts: weight (Cout, Cin, K), bias (Cout,)
            w1=0.01 * jax.random.normal(keys[0], (out_ch, in_ch, kernel_size), jnp.float32),
            b1=0.1 * jax.random.normal(keys[1], (out_ch,), jnp.float32),
            w2=0.01 * jax.random.normal(keys[2], (out_ch, out_ch, kernel_size), jnp.float32),
            b2=0.1 * jax.random.normal(keys[3], (out_ch,), jnp.float32),
            # 1x1 downsample stored as (Cin, Cout) matmul weight (used iff Cin != Cout)
            wd=(0.01 * jax.random.normal(keys[4], (in_ch, out_ch), jnp.float32)
                if has_ds else jnp.eye(out_ch, dtype=jnp.float32)),
            bd=(0.1 * jax.random.normal(keys[5], (out_ch,), jnp.float32)
                if has_ds else jnp.zeros((out_ch,), jnp.float32)),
            dilation=2 ** i, kernel_size=kernel_size, has_downsample=has_ds,
        ))
        in_ch = out_ch
    fc_w = 0.1 * jax.random.normal(jax.random.fold_in(key, 100),
                                   (num_classes, num_channels[-1]), jnp.float32)
    fc_b = 0.1 * jax.random.normal(jax.random.fold_in(key, 101),
                                   (num_classes,), jnp.float32)
    return dict(blocks=blocks, fc_w=fc_w, fc_b=fc_b)


# --------------------------------------------------------------------------- main
if __name__ == "__main__":
    B, L, INPUT_DIM = 2, 16, 4
    NUM_CLASSES = 3
    NUM_CHANNELS = [64, 64]
    KERNEL_SIZE = 3

    key = jax.random.PRNGKey(0)
    x = jax.random.normal(jax.random.fold_in(key, 999), (B, L, INPUT_DIM), jnp.float32)
    params = make_params(key, INPUT_DIM, NUM_CLASSES, NUM_CHANNELS, KERNEL_SIZE)

    # One-time layout / packing / casting work (hoisted out of the forward pass).
    wslab, bslab, maskslab, meta = preprocess_params(params, batch=B, seq_len=L)

    out = tcn_classifier_forward(x, wslab, bslab, maskslab, meta)
    out = jax.block_until_ready(out)

    ref = jax.block_until_ready(ref_forward(x, params))
    assert out.shape == (B, NUM_CLASSES)
    # Conv matmuls run with bf16 inputs (f32 accumulation); the head stays f32, so
    # the result tracks the pure-f32 reference to well within 5e-3.
    assert jnp.allclose(out, ref, atol=5e-3, rtol=5e-3), (out, ref)

    print("KERNEL_OK")
</pallas_src>

<mosaic_0001>
module attributes {stable_mosaic.version = 11 : i64} {
  func.func @fused_tcn_kernel(%arg0: memref<32x64xf32, #tpu.memory_space<vmem>>, %arg1: memref<13x64x128xbf16, #tpu.memory_space<vmem>>, %arg2: memref<5x128xf32, #tpu.memory_space<vmem>>, %arg3: memref<3x32x1xf32, #tpu.memory_space<vmem>>, %arg4: memref<2x128xf32, #tpu.memory_space<vmem>>) attributes {dimension_semantics = [], scalar_prefetch = 0 : i64, scratch_operands = 0 : i64, tpu.core_type = #tpu.core_type<tc>} {
    %c0 = arith.constant 0 : index
    %c0_0 = arith.constant 0 : index
    %0 = vector.load %arg0[%c0, %c0_0] : memref<32x64xf32, #tpu.memory_space<vmem>>, vector<32x64xf32>
    %1 = arith.truncf %0 : vector<32x64xf32> to vector<32x64xbf16>
    %c0_1 = arith.constant 0 : index
    %c0_2 = arith.constant 0 : index
    %c0_3 = arith.constant 0 : index
    %2 = vector.load %arg1[%c0_1, %c0_2, %c0_3] : memref<13x64x128xbf16, #tpu.memory_space<vmem>>, vector<1x64x128xbf16>
    %3 = vector.shape_cast %2 : vector<1x64x128xbf16> to vector<64x128xbf16>
    %cst = arith.constant dense<0.000000e+00> : vector<32x128xf32>
    %4 = tpu.matmul %1, %3, %cst {dimension_numbers = #tpu.dot_dimension_numbers<[1], [0], [0], [1], [0, 0, 1, 1], [], []>} : vector<32x64xbf16>, vector<64x128xbf16>, vector<32x128xf32> -> vector<32x128xf32>
    %c1_i32 = arith.constant 1 : i32
    %5 = tpu.dynamic_rotate %0 by %c1_i32 dim 0 : vector<32x64xf32>, i32 -> vector<32x64xf32>
    %c0_4 = arith.constant 0 : index
    %c0_5 = arith.constant 0 : index
    %c0_6 = arith.constant 0 : index
    %6 = vector.load %arg3[%c0_4, %c0_5, %c0_6] : memref<3x32x1xf32, #tpu.memory_space<vmem>>, vector<1x32x1xf32>
    %7 = vector.shape_cast %6 : vector<1x32x1xf32> to vector<32x1xf32>
    %8 = vector.broadcast %7 : vector<32x1xf32> to vector<32x64xf32>
    %9 = arith.mulf %5, %8 : vector<32x64xf32>
    %10 = arith.truncf %9 : vector<32x64xf32> to vector<32x64xbf16>
    %c1 = arith.constant 1 : index
    %c0_7 = arith.constant 0 : index
    %c0_8 = arith.constant 0 : index
    %11 = vector.load %arg1[%c1, %c0_7, %c0_8] : memref<13x64x128xbf16, #tpu.memory_space<vmem>>, vector<1x64x128xbf16>
    %12 = vector.shape_cast %11 : vector<1x64x128xbf16> to vector<64x128xbf16>
    %cst_9 = arith.constant dense<0.000000e+00> : vector<32x128xf32>
    %13 = tpu.matmul %10, %12, %cst_9 {dimension_numbers = #tpu.dot_dimension_numbers<[1], [0], [0], [1], [0, 0, 1, 1], [], []>} : vector<32x64xbf16>, vector<64x128xbf16>, vector<32x128xf32> -> vector<32x128xf32>
    %14 = arith.addf %4, %13 : vector<32x128xf32>
    %c2_i32 = arith.constant 2 : i32
    %15 = tpu.dynamic_rotate %0 by %c2_i32 dim 0 : vector<32x64xf32>, i32 -> vector<32x64xf32>
    %c1_10 = arith.constant 1 : index
    %c0_11 = arith.constant 0 : index
    %c0_12 = arith.constant 0 : index
    %16 = vector.load %arg3[%c1_10, %c0_11, %c0_12] : memref<3x32x1xf32, #tpu.memory_space<vmem>>, vector<1x32x1xf32>
    %17 = vector.shape_cast %16 : vector<1x32x1xf32> to vector<32x1xf32>
    %18 = vector.broadcast %17 : vector<32x1xf32> to vector<32x64xf32>
    %19 = arith.mulf %15, %18 : vector<32x64xf32>
    %20 = arith.truncf %19 : vector<32x64xf32> to vector<32x64xbf16>
    %c2 = arith.constant 2 : index
    %c0_13 = arith.constant 0 : index
    %c0_14 = arith.constant 0 : index
    %21 = vector.load %arg1[%c2, %c0_13, %c0_14] : memref<13x64x128xbf16, #tpu.memory_space<vmem>>, vector<1x64x128xbf16>
    %22 = vector.shape_cast %21 : vector<1x64x128xbf16> to vector<64x128xbf16>
    %cst_15 = arith.constant dense<0.000000e+00> : vector<32x128xf32>
    %23 = tpu.matmul %20, %22, %cst_15 {dimension_numbers = #tpu.dot_dimension_numbers<[1], [0], [0], [1], [0, 0, 1, 1], [], []>} : vector<32x64xbf16>, vector<64x128xbf16>, vector<32x128xf32> -> vector<32x128xf32>
    %24 = arith.addf %14, %23 : vector<32x128xf32>
    %c0_16 = arith.constant 0 : index
    %c0_17 = arith.constant 0 : index
    %25 = vector.load %arg2[%c0_16, %c0_17] : memref<5x128xf32, #tpu.memory_space<vmem>>, vector<1x128xf32>
    %26 = vector.broadcast %25 : vector<1x128xf32> to vector<32x128xf32>
    %27 = arith.addf %24, %26 : vector<32x128xf32>
    %28 = vector.extract_strided_slice %27 {offsets = [0, 0], sizes = [32, 64], strides = [1, 1]} : vector<32x128xf32> to vector<32x64xf32>
    %cst_18 = arith.constant 0.000000e+00 : f32
    %29 = vector.broadcast %cst_18 : f32 to vector<32x64xf32>
    %30 = arith.maximumf %28, %29 : vector<32x64xf32>
    %31 = vector.extract_strided_slice %27 {offsets = [0, 64], sizes = [32, 64], strides = [1, 1]} : vector<32x128xf32> to vector<32x64xf32>
    %32 = arith.truncf %30 : vector<32x64xf32> to vector<32x64xbf16>
    %c3 = arith.constant 3 : index
    %c0_19 = arith.constant 0 : index
    %c0_20 = arith.constant 0 : index
    %33 = vector.load %arg1[%c3, %c0_19, %c0_20] : memref<13x64x128xbf16, #tpu.memory_space<vmem>>, vector<1x64x64xbf16>
    %34 = vector.shape_cast %33 : vector<1x64x64xbf16> to vector<64x64xbf16>
    %cst_21 = arith.constant dense<0.000000e+00> : vector<32x64xf32>
    %35 = tpu.matmul %32, %34, %cst_21 {dimension_numbers = #tpu.dot_dimension_numbers<[1], [0], [0], [1], [0, 0, 1, 1], [], []>} : vector<32x64xbf16>, vector<64x64xbf16>, vector<32x64xf32> -> vector<32x64xf32>
    %c1_i32_22 = arith.constant 1 : i32
    %36 = tpu.dynamic_rotate %30 by %c1_i32_22 dim 0 : vector<32x64xf32>, i32 -> vector<32x64xf32>
    %c0_23 = arith.constant 0 : index
    %c0_24 = arith.constant 0 : index
    %c0_25 = arith.constant 0 : index
    %37 = vector.load %arg3[%c0_23, %c0_24, %c0_25] : memref<3x32x1xf32, #tpu.memory_space<vmem>>, vector<1x32x1xf32>
    %38 = vector.shape_cast %37 : vector<1x32x1xf32> to vector<32x1xf32>
    %39 = vector.broadcast %38 : vector<32x1xf32> to vector<32x64xf32>
    %40 = arith.mulf %36, %39 : vector<32x64xf32>
    %41 = arith.truncf %40 : vector<32x64xf32> to vector<32x64xbf16>
    %c4 = arith.constant 4 : index
    %c0_26 = arith.constant 0 : index
    %c0_27 = arith.constant 0 : index
    %42 = vector.load %arg1[%c4, %c0_26, %c0_27] : memref<13x64x128xbf16, #tpu.memory_space<vmem>>, vector<1x64x64xbf16>
    %43 = vector.shape_cast %42 : vector<1x64x64xbf16> to vector<64x64xbf16>
    %cst_28 = arith.constant dense<0.000000e+00> : vector<32x64xf32>
    %44 = tpu.matmul %41, %43, %cst_28 {dimension_numbers = #tpu.dot_dimension_numbers<[1], [0], [0], [1], [0, 0, 1, 1], [], []>} : vector<32x64xbf16>, vector<64x64xbf16>, vector<32x64xf32> -> vector<32x64xf32>
    %45 = arith.addf %35, %44 : vector<32x64xf32>
    %c2_i32_29 = arith.constant 2 : i32
    %46 = tpu.dynamic_rotate %30 by %c2_i32_29 dim 0 : vector<32x64xf32>, i32 -> vector<32x64xf32>
    %c1_30 = arith.constant 1 : index
    %c0_31 = arith.constant 0 : index
    %c0_32 = arith.constant 0 : index
    %47 = vector.load %arg3[%c1_30, %c0_31, %c0_32] : memref<3x32x1xf32, #tpu.memory_space<vmem>>, vector<1x32x1xf32>
    %48 = vector.shape_cast %47 : vector<1x32x1xf32> to vector<32x1xf32>
    %49 = vector.broadcast %48 : vector<32x1xf32> to vector<32x64xf32>
    %50 = arith.mulf %46, %49 : vector<32x64xf32>
    %51 = arith.truncf %50 : vector<32x64xf32> to vector<32x64xbf16>
    %c5 = arith.constant 5 : index
    %c0_33 = arith.constant 0 : index
    %c0_34 = arith.constant 0 : index
    %52 = vector.load %arg1[%c5, %c0_33, %c0_34] : memref<13x64x128xbf16, #tpu.memory_space<vmem>>, vector<1x64x64xbf16>
    %53 = vector.shape_cast %52 : vector<1x64x64xbf16> to vector<64x64xbf16>
    %cst_35 = arith.constant dense<0.000000e+00> : vector<32x64xf32>
    %54 = tpu.matmul %51, %53, %cst_35 {dimension_numbers = #tpu.dot_dimension_numbers<[1], [0], [0], [1], [0, 0, 1, 1], [], []>} : vector<32x64xbf16>, vector<64x64xbf16>, vector<32x64xf32> -> vector<32x64xf32>
    %55 = arith.addf %45, %54 : vector<32x64xf32>
    %c1_36 = arith.constant 1 : index
    %c0_37 = arith.constant 0 : index
    %56 = vector.load %arg2[%c1_36, %c0_37] : memref<5x128xf32, #tpu.memory_space<vmem>>, vector<1x64xf32>
    %57 = vector.broadcast %56 : vector<1x64xf32> to vector<32x64xf32>
    %58 = arith.addf %55, %57 : vector<32x64xf32>
    %cst_38 = arith.constant 0.000000e+00 : f32
    %59 = vector.broadcast %cst_38 : f32 to vector<32x64xf32>
    %60 = arith.maximumf %58, %59 : vector<32x64xf32>
    %61 = arith.addf %60, %31 : vector<32x64xf32>
    %cst_39 = arith.constant 0.000000e+00 : f32
    %62 = vector.broadcast %cst_39 : f32 to vector<32x64xf32>
    %63 = arith.maximumf %61, %62 : vector<32x64xf32>
    %64 = arith.truncf %63 : vector<32x64xf32> to vector<32x64xbf16>
    %c6 = arith.constant 6 : index
    %c0_40 = arith.constant 0 : index
    %c0_41 = arith.constant 0 : index
    %65 = vector.load %arg1[%c6, %c0_40, %c0_41] : memref<13x64x128xbf16, #tpu.memory_space<vmem>>, vector<1x64x64xbf16>
    %66 = vector.shape_cast %65 : vector<1x64x64xbf16> to vector<64x64xbf16>
    %cst_42 = arith.constant dense<0.000000e+00> : vector<32x64xf32>
    %67 = tpu.matmul %64, %66, %cst_42 {dimension_numbers = #tpu.dot_dimension_numbers<[1], [0], [0], [1], [0, 0, 1, 1], [], []>} : vector<32x64xbf16>, vector<64x64xbf16>, vector<32x64xf32> -> vector<32x64xf32>
    %c2_i32_43 = arith.constant 2 : i32
    %68 = tpu.dynamic_rotate %63 by %c2_i32_43 dim 0 : vector<32x64xf32>, i32 -> vector<32x64xf32>
    %c1_44 = arith.constant 1 : index
    %c0_45 = arith.constant 0 : index
    %c0_46 = arith.constant 0 : index
    %69 = vector.load %arg3[%c1_44, %c0_45, %c0_46] : memref<3x32x1xf32, #tpu.memory_space<vmem>>, vector<1x32x1xf32>
    %70 = vector.shape_cast %69 : vector<1x32x1xf32> to vector<32x1xf32>
    %71 = vector.broadcast %70 : vector<32x1xf32> to vector<32x64xf32>
    %72 = arith.mulf %68, %71 : vector<32x64xf32>
    %73 = arith.truncf %72 : vector<32x64xf32> to vector<32x64xbf16>
    %c7 = arith.constant 7 : index
    %c0_47 = arith.constant 0 : index
    %c0_48 = arith.constant 0 : index
    %74 = vector.load %arg1[%c7, %c0_47, %c0_48] : memref<13x64x128xbf16, #tpu.memory_space<vmem>>, vector<1x64x64xbf16>
    %75 = vector.shape_cast %74 : vector<1x64x64xbf16> to vector<64x64xbf16>
    %cst_49 = arith.constant dense<0.000000e+00> : vector<32x64xf32>
    %76 = tpu.matmul %73, %75, %cst_49 {dimension_numbers = #tpu.dot_dimension_numbers<[1], [0], [0], [1], [0, 0, 1, 1], [], []>} : vector<32x64xbf16>, vector<64x64xbf16>, vector<32x64xf32> -> vector<32x64xf32>
    %77 = arith.addf %67, %76 : vector<32x64xf32>
    %c4_i32 = arith.constant 4 : i32
    %78 = tpu.dynamic_rotate %63 by %c4_i32 dim 0 : vector<32x64xf32>, i32 -> vector<32x64xf32>
    %c2_50 = arith.constant 2 : index
    %c0_51 = arith.constant 0 : index
    %c0_52 = arith.constant 0 : index
    %79 = vector.load %arg3[%c2_50, %c0_51, %c0_52] : memref<3x32x1xf32, #tpu.memory_space<vmem>>, vector<1x32x1xf32>
    %80 = vector.shape_cast %79 : vector<1x32x1xf32> to vector<32x1xf32>
    %81 = vector.broadcast %80 : vector<32x1xf32> to vector<32x64xf32>
    %82 = arith.mulf %78, %81 : vector<32x64xf32>
    %83 = arith.truncf %82 : vector<32x64xf32> to vector<32x64xbf16>
    %c8 = arith.constant 8 : index
    %c0_53 = arith.constant 0 : index
    %c0_54 = arith.constant 0 : index
    %84 = vector.load %arg1[%c8, %c0_53, %c0_54] : memref<13x64x128xbf16, #tpu.memory_space<vmem>>, vector<1x64x64xbf16>
    %85 = vector.shape_cast %84 : vector<1x64x64xbf16> to vector<64x64xbf16>
    %cst_55 = arith.constant dense<0.000000e+00> : vector<32x64xf32>
    %86 = tpu.matmul %83, %85, %cst_55 {dimension_numbers = #tpu.dot_dimension_numbers<[1], [0], [0], [1], [0, 0, 1, 1], [], []>} : vector<32x64xbf16>, vector<64x64xbf16>, vector<32x64xf32> -> vector<32x64xf32>
    %87 = arith.addf %77, %86 : vector<32x64xf32>
    %c2_56 = arith.constant 2 : index
    %c0_57 = arith.constant 0 : index
    %88 = vector.load %arg2[%c2_56, %c0_57] : memref<5x128xf32, #tpu.memory_space<vmem>>, vector<1x64xf32>
    %89 = vector.broadcast %88 : vector<1x64xf32> to vector<32x64xf32>
    %90 = arith.addf %87, %89 : vector<32x64xf32>
    %cst_58 = arith.constant 0.000000e+00 : f32
    %91 = vector.broadcast %cst_58 : f32 to vector<32x64xf32>
    %92 = arith.maximumf %90, %91 : vector<32x64xf32>
    %93 = arith.truncf %92 : vector<32x64xf32> to vector<32x64xbf16>
    %c9 = arith.constant 9 : index
    %c0_59 = arith.constant 0 : index
    %c0_60 = arith.constant 0 : index
    %94 = vector.load %arg1[%c9, %c0_59, %c0_60] : memref<13x64x128xbf16, #tpu.memory_space<vmem>>, vector<1x64x64xbf16>
    %95 = vector.shape_cast %94 : vector<1x64x64xbf16> to vector<64x64xbf16>
    %cst_61 = arith.constant dense<0.000000e+00> : vector<32x64xf32>
    %96 = tpu.matmul %93, %95, %cst_61 {dimension_numbers = #tpu.dot_dimension_numbers<[1], [0], [0], [1], [0, 0, 1, 1], [], []>} : vector<32x64xbf16>, vector<64x64xbf16>, vector<32x64xf32> -> vector<32x64xf32>
    %c2_i32_62 = arith.constant 2 : i32
    %97 = tpu.dynamic_rotate %92 by %c2_i32_62 dim 0 : vector<32x64xf32>, i32 -> vector<32x64xf32>
    %c1_63 = arith.constant 1 : index
    %c0_64 = arith.constant 0 : index
    %c0_65 = arith.constant 0 : index
    %98 = vector.load %arg3[%c1_63, %c0_64, %c0_65] : memref<3x32x1xf32, #tpu.memory_space<vmem>>, vector<1x32x1xf32>
    %99 = vector.shape_cast %98 : vector<1x32x1xf32> to vector<32x1xf32>
    %100 = vector.broadcast %99 : vector<32x1xf32> to vector<32x64xf32>
    %101 = arith.mulf %97, %100 : vector<32x64xf32>
    %102 = arith.truncf %101 : vector<32x64xf32> to vector<32x64xbf16>
    %c10 = arith.constant 10 : index
    %c0_66 = arith.constant 0 : index
    %c0_67 = arith.constant 0 : index
    %103 = vector.load %arg1[%c10, %c0_66, %c0_67] : memref<13x64x128xbf16, #tpu.memory_space<vmem>>, vector<1x64x64xbf16>
    %104 = vector.shape_cast %103 : vector<1x64x64xbf16> to vector<64x64xbf16>
    %cst_68 = arith.constant dense<0.000000e+00> : vector<32x64xf32>
    %105 = tpu.matmul %102, %104, %cst_68 {dimension_numbers = #tpu.dot_dimension_numbers<[1], [0], [0], [1], [0, 0, 1, 1], [], []>} : vector<32x64xbf16>, vector<64x64xbf16>, vector<32x64xf32> -> vector<32x64xf32>
    %106 = arith.addf %96, %105 : vector<32x64xf32>
    %c4_i32_69 = arith.constant 4 : i32
    %107 = tpu.dynamic_rotate %92 by %c4_i32_69 dim 0 : vector<32x64xf32>, i32 -> vector<32x64xf32>
    %c2_70 = arith.constant 2 : index
    %c0_71 = arith.constant 0 : index
    %c0_72 = arith.constant 0 : index
    %108 = vector.load %arg3[%c2_70, %c0_71, %c0_72] : memref<3x32x1xf32, #tpu.memory_space<vmem>>, vector<1x32x1xf32>
    %109 = vector.shape_cast %108 : vector<1x32x1xf32> to vector<32x1xf32>
    %110 = vector.broadcast %109 : vector<32x1xf32> to vector<32x64xf32>
    %111 = arith.mulf %107, %110 : vector<32x64xf32>
    %112 = arith.truncf %111 : vector<32x64xf32> to vector<32x64xbf16>
    %c11 = arith.constant 11 : index
    %c0_73 = arith.constant 0 : index
    %c0_74 = arith.constant 0 : index
    %113 = vector.load %arg1[%c11, %c0_73, %c0_74] : memref<13x64x128xbf16, #tpu.memory_space<vmem>>, vector<1x64x64xbf16>
    %114 = vector.shape_cast %113 : vector<1x64x64xbf16> to vector<64x64xbf16>
    %cst_75 = arith.constant dense<0.000000e+00> : vector<32x64xf32>
    %115 = tpu.matmul %112, %114, %cst_75 {dimension_numbers = #tpu.dot_dimension_numbers<[1], [0], [0], [1], [0, 0, 1, 1], [], []>} : vector<32x64xbf16>, vector<64x64xbf16>, vector<32x64xf32> -> vector<32x64xf32>
    %116 = arith.addf %106, %115 : vector<32x64xf32>
    %c3_76 = arith.constant 3 : index
    %c0_77 = arith.constant 0 : index
    %117 = vector.load %arg2[%c3_76, %c0_77] : memref<5x128xf32, #tpu.memory_space<vmem>>, vector<1x64xf32>
    %118 = vector.broadcast %117 : vector<1x64xf32> to vector<32x64xf32>
    %119 = arith.addf %116, %118 : vector<32x64xf32>
    %cst_78 = arith.constant 0.000000e+00 : f32
    %120 = vector.broadcast %cst_78 : f32 to vector<32x64xf32>
    %121 = arith.maximumf %119, %120 : vector<32x64xf32>
    %122 = arith.addf %121, %63 : vector<32x64xf32>
    %cst_79 = arith.constant 0.000000e+00 : f32
    %123 = vector.broadcast %cst_79 : f32 to vector<32x64xf32>
    %124 = arith.maximumf %122, %123 : vector<32x64xf32>
    %125 = tpu.iota {dimensions = array<i32: 1>} : vector<2x32xi32>
    %126 = tpu.iota {dimensions = array<i32: 0>} : vector<2x32xi32>
    %c16_i32 = arith.constant 16 : i32
    %127 = vector.broadcast %c16_i32 : i32 to vector<2x32xi32>
    %128 = arith.muli %126, %127 : vector<2x32xi32>
    %129 = arith.cmpi sge, %125, %128 : vector<2x32xi32>
    %c16_i32_80 = arith.constant 16 : i32
    %130 = vector.broadcast %c16_i32_80 : i32 to vector<2x32xi32>
    %131 = arith.addi %128, %130 : vector<2x32xi32>
    %132 = arith.cmpi slt, %125, %131 : vector<2x32xi32>
    %133 = arith.andi %129, %132 : vector<2x32xi1>
    %cst_81 = arith.constant 6.250000e-02 : f32
    %cst_82 = arith.constant 0.000000e+00 : f32
    %134 = vector.broadcast %cst_81 : f32 to vector<2x32xf32>
    %135 = vector.broadcast %cst_82 : f32 to vector<2x32xf32>
    %136 = arith.select %133, %134, %135 : vector<2x32xi1>, vector<2x32xf32>
    %cst_83 = arith.constant dense<0.000000e+00> : vector<2x64xf32>
    %137 = tpu.matmul %136, %124, %cst_83 {dimension_numbers = #tpu.dot_dimension_numbers<[1], [0], [0], [1], [0, 0, 1, 1], [], []>} : vector<2x32xf32>, vector<32x64xf32>, vector<2x64xf32> -> vector<2x64xf32>
    %c12 = arith.constant 12 : index
    %c0_84 = arith.constant 0 : index
    %c0_85 = arith.constant 0 : index
    %138 = vector.load %arg1[%c12, %c0_84, %c0_85] : memref<13x64x128xbf16, #tpu.memory_space<vmem>>, vector<1x64x128xbf16>
    %139 = vector.shape_cast %138 : vector<1x64x128xbf16> to vector<64x128xbf16>
    %140 = arith.extf %139 : vector<64x128xbf16> to vector<64x128xf32>
    %cst_86 = arith.constant dense<0.000000e+00> : vector<2x128xf32>
    %141 = tpu.matmul %137, %140, %cst_86 {dimension_numbers = #tpu.dot_dimension_numbers<[1], [0], [0], [1], [0, 0, 1, 1], [], []>} : vector<2x64xf32>, vector<64x128xf32>, vector<2x128xf32> -> vector<2x128xf32>
    %c4_87 = arith.constant 4 : index
    %c0_88 = arith.constant 0 : index
    %142 = vector.load %arg2[%c4_87, %c0_88] : memref<5x128xf32, #tpu.memory_space<vmem>>, vector<1x128xf32>
    %143 = vector.broadcast %142 : vector<1x128xf32> to vector<2x128xf32>
    %144 = arith.addf %141, %143 : vector<2x128xf32>
    %c0_89 = arith.constant 0 : index
    %c0_90 = arith.constant 0 : index
    %145 = vector.load %arg4[%c0_89, %c0_90] : memref<2x128xf32, #tpu.memory_space<vmem>>, vector<2x128xf32>
    tpu.vector_store %arg4[%c0_89, %c0_90], %144 {strides = array<i32>} : memref<2x128xf32, #tpu.memory_space<vmem>>, vector<2x128xf32>,
    return
  }
}

</mosaic_0001>

<bundles_post_ra>
// kernel: tpu_custom_call.1
= control target key start
LH: loop header
LB: loop body
LE: loop exit
PB: predicated region body
PF: predicated region fallthrough
CT: control target
= control target key end

     0   :  { %9 = vsyncpa [#allocation3], 0  ;;  %s1756_s0 = inlined_call_operand.vmem [shape: f32[32,64], index: 0, kind: input, shape index: {}]   ;;  %s1757_s1 = inlined_call_operand.hbm [shape: bf16[13,64,128], index: 1, kind: input, shape index: {}]   ;;  %s1758_s2 = inlined_call_operand.vmem [shape: f32[5,128], index: 2, kind: input, shape index: {}]   ;;  %s1759_s3 = inlined_call_operand.vmem [shape: f32[3,32,1], index: 3, kind: input, shape index: {}]   ;;  %s1760_s4 = inlined_call_operand.hbm [shape: f32[2,128], index: 4, kind: output, shape index: {}]  }
   0x1   :  { %10 = vsyncpa [#allocation4], 0  ;;  %s17_s17 = sshll.u32 %s1757_s1, 4  ;;  %s1473_s18 = smov [#allocation2]   ;;  %s18_s17 = int_to_ptr.hbm [resolvable:$true] %s17_s17 }
   0x2   :  { %s19_s19 = sshll.u32 %s1473_s18, 4  ;;  %s1474_s20 = smov 64   ;;  %s20_s19 = int_to_ptr.vmem [resolvable:$true] %s19_s19 }
   0x3   :  { %s1475_s21 = smov 4  }
   0x4   :  { %25 = dma.hbm_to_vmem [thread:$0]  %s18_s17, 6656, %s20_s19, [#allocation3], %s1474_s20, %s1474_s20, %s1475_s21  }
   0x5   :  { %1469 = dma.done.wait [#allocation3], 6656  }
   0x6   :  { %1470 = vsyncadd [#allocation3], 4294960640  ;;  %v1476_v0 = vmov 0   ;;  %v1150_v1 = vld [vmem:[%s1759_s3 + $0x20] sm:$0xff]  ;;  %v1152_v3 = vld [vmem:[%s1759_s3 + $0x30] sm:$0xff]  ;;  %vm123_vm0 = vcmask 523264   ;;  %v53_v27 = vlaneseq }
   0x7   :  { %1414 = vset.pattern.permute.xlu1 %v1476_v0  ;;  %1413 = vset.pattern.permute.xlu0 %v1476_v0  ;;  %v60_v2 = vld [vmem:[%s1759_s3] sm:$0xff]  ;;  %v1343_v4 = vld [vmem:[#allocation2 + $0x18] sm:$0xff]  ;;  %v1342_v6 = vld [vmem:[#allocation2 + $0x10] sm:$0xff]  ;;  %vm1030_vm7 = vcmask 261120   ;;  %s1478_s8 = smov [#allocation5]   ;;  %s1104_s12 = sshll.u32 %s1760_s4, 4  ;;  %s1105_s12 = int_to_ptr.hbm [resolvable:$true] %s1104_s12 }
   0x8   :  { %1415 = vset.pattern.permute.xlu2 %v1476_v0  ;;  %214 = vperm.xlu0 %1413, %v1150_v1   ;;  %v1347_v5 = vld [vmem:[#allocation2 + $0x38] sm:$0xff]  ;;  %v1151_v8 = vld [vmem:[%s1759_s3 + $0x28] sm:$0xff]  ;;  %v62_v11 = vld [vmem:[%s1759_s3 + $0x10] sm:$0xff]  ;;  %v1548_v28 = vshrl.u32 %v53_v27, 7  ;;  %s1102_s9 = sshll.u32 %s1478_s8, 4  ;;  %s1103_s9 = int_to_ptr.vmem [resolvable:$true] %s1102_s9 }
   0x9   :  { %66 = vperm.xlu1 %1414, %v60_v2   ;;  %224 = vperm.xlu2 %1415, %v1152_v3   ;;  %v1351_v7 = vld [vmem:[#allocation2 + $0x58] sm:$0xff]  ;;  %v61_v9 = vld [vmem:[%s1759_s3 + $0x8] sm:$0xff]  ;;  %v1346_v13 = vld [vmem:[#allocation2 + $0x30] sm:$0xff] }
   0xa   :  { %183 = vmatpush.bf16.msra.mxu1 %v1343_v4  ;;  %134 = vmatpush.bf16.msra.mxu0 %v1347_v5  ;;  %v1153_v10 = vld [vmem:[%s1759_s3 + $0x38] sm:$0xff]  ;;  %v1341_v14 = vld [vmem:[#allocation2 + $0x8] sm:$0xff]  ;;  %v1350_v15 = vld [vmem:[#allocation2 + $0x50] sm:$0xff]  ;;  %vm202_vm1 = vcmp.lt.s32.totalorder %v1548_v28, 2  ;;  %vm55_vm2 = vcmp.lt.s32.totalorder %v1548_v28, 1  ;;  %vm688_vm3 = vcmp.lt.s32.totalorder %v1548_v28, 4 }
   0xb   :  { %281 = vmatpush.bf16.msra.mxu2 %v1351_v7  ;;  %v63_v12 = vld [vmem:[%s1759_s3 + $0x18] sm:$0xff]  ;;  %v1345_v16 = vld [vmem:[#allocation2 + $0x28] sm:$0xff]  ;;  %v1340_v17 = vld [vmem:[#allocation2] sm:$0xff] }
   0xc   :  { %v1349_v18 = vld [vmem:[#allocation2 + $0x48] sm:$0xff]  ;;  %v35_v20 = vld [vmem:[%s1756_s0] sm:$0xff]  ;;  %v38_v24 = vld [vmem:[%s1756_s0 + $0x18] sm:$0xff] }
   0xd   :  { %v36_v19 = vld [vmem:[%s1756_s0 + $0x8] sm:$0xff]  ;;  %v1344_v22 = vld [vmem:[#allocation2 + $0x20] sm:$0xff]  ;;  %v37_v25 = vld [vmem:[%s1756_s0 + $0x10] sm:$0xff]  ;;  %v198_v31 = vrot.slane %v35_v20, 6  ;;  %v201_v32 = vrot.slane %v38_v24, 6  ;;  %v49_v33 = vrot.slane %v35_v20, 7 }
   0xe   :  { %184 = vmatpush.bf16.msra.mxu1 %v1342_v6  ;;  %135 = vmatpush.bf16.msra.mxu0 %v1346_v13  ;;  %v39_v21 = vpack.c.bf16 %v36_v19, %v35_v20  ;;  %v1348_v23 = vld [vmem:[#allocation2 + $0x40] sm:$0xff]  ;;  %v40_v26 = vpack.c.bf16 %v38_v24, %v37_v25  ;;  %v52_v34 = vrot.slane %v38_v24, 7  ;;  %v199_v35 = vrot.slane %v36_v19, 6  ;;  %v1355_v1 = vld [vmem:[#allocation2 + $0x78] sm:$0xff]  ;;  %v1354_v2 = vld [vmem:[#allocation2 + $0x70] sm:$0xff] }
   0xf   :  { %282 = vmatpush.bf16.msra.mxu2 %v1350_v15  ;;  %v50_v36 = vrot.slane %v36_v19, 7  ;;  %v206_v37 = vsel %vm202_vm1, %v201_v32, %v198_v31  ;;  %v200_v50 = vrot.slane %v37_v25, 6  ;;  %v51_v51 = vrot.slane %v37_v25, 7  ;;  %v1353_v3 = vld [vmem:[#allocation2 + $0x68] sm:$0xff]  ;;  %v1352_v4 = vld [vmem:[#allocation2 + $0x60] sm:$0xff]  ;;  %v1359_v5 = vld [vmem:[#allocation2 + $0x98] sm:$0xff] }
  0x10   :  { %219 = vperm.xlu0 %1413, %v1151_v8   ;;  %v59_v38 = vsel %vm55_vm2, %v52_v34, %v49_v33  ;;  %v205_v39 = vsel %vm202_vm1, %v198_v31, %v199_v35  ;;  %v1363_v6 = vld [vmem:[#allocation2 + $0xb8] sm:$0xff]  ;;  %378 = vmatpush.bf16.msra.mxu3 %v1359_v5  ;;  %v1358_v8 = vld [vmem:[#allocation2 + $0x90] sm:$0xff] }
  0x11   :  { %71 = vperm.xlu1 %1414, %v61_v9   ;;  %229 = vperm.xlu2 %1415, %v1153_v10   ;;  %v58_v40 = vsel %vm55_vm2, %v49_v33, %v50_v36  ;;  %v204_v53 = vsel %vm202_vm1, %v199_v35, %v200_v50  ;;  %v203_v54 = vsel %vm202_vm1, %v200_v50, %v201_v32  ;;  %v1362_v9 = vld [vmem:[#allocation2 + $0xb0] sm:$0xff] }
  0x12   :  { %185 = vmatpush.bf16.msra.mxu1 %v1341_v14  ;;  %136 = vmatpush.bf16.msra.mxu0 %v1345_v16  ;;  %v57_v56 = vsel %vm55_vm2, %v50_v36, %v51_v51  ;;  %v56_v58 = vsel %vm55_vm2, %v51_v51, %v52_v34  ;;  %v1416_v14 = vld [vmem:[%s1758_s2] ss:$0 sm:$0xff]  ;;  %v1265_v51 = vld [vmem:[%s1759_s3 + $0x58] sm:$0xff] }
  0x13   :  { %283 = vmatpush.bf16.msra.mxu2 %v1349_v18  ;;  %v1360_v18 = vld [vmem:[#allocation2 + $0xa0] sm:$0xff] }
  0x14   :  { %379 = vmatpush.bf16.msra.mxu3 %v1358_v8 }
  0x16   :  { %186 = vmatpush.bf16.msra.mxu1 %v1340_v17  ;;  %137 = vmatpush.bf16.msra.mxu0 %v1344_v22  ;;  %v1356_v17 = vld [vmem:[#allocation2 + $0x80] sm:$0xff] }
  0x17   :  { %284 = vmatpush.bf16.msra.mxu2 %v1348_v23 }
  0x18   :  { %76 = vperm.xlu0 %1413, %v62_v11   ;;  %v1357_v11 = vld [vmem:[#allocation2 + $0x88] sm:$0xff] }
  0x19   :  { %81 = vperm.xlu1 %1414, %v63_v12   ;;  %1148 = vmatmul.msk.bf16.vlgmr.msra.gmra.mxu1 %vm123_vm0, %v39_v21  ;;  %v1361_v12 = vld [vmem:[#allocation2 + $0xa8] sm:$0xff] }
  0x1a   :  { %427 = vmatpush.bf16.msrb.mxu0 %v1355_v1  ;;  %499 = vmatpush.bf16.msrb.mxu1 %v1363_v6 }
  0x1b   :  { %380 = vmatpush.bf16.msra.mxu3 %v1357_v11 }
  0x1e   :  { %428 = vmatpush.bf16.msrb.mxu0 %v1354_v2  ;;  %500 = vmatpush.bf16.msrb.mxu1 %v1362_v9 }
  0x1f   :  { %381 = vmatpush.bf16.msra.mxu3 %v1356_v17 }
  0x22   :  { %429 = vmatpush.bf16.msrb.mxu0 %v1353_v3  ;;  %501 = vmatpush.bf16.msrb.mxu1 %v1361_v12 }
  0x26   :  { %430 = vmatpush.bf16.msrb.mxu0 %v1352_v4  ;;  %502 = vmatpush.bf16.msrb.mxu1 %v1360_v18 }
  0x29   :  { %1149 = vmatmul.msk.bf16.gmra.mxu1 %vm123_vm0, %v40_v26  ;;  %v1262_v26 = vld [vmem:[%s1759_s3 + $0x40] sm:$0xff] }
  0x63   :  { %v1570_v45 = vpop.permute.xlu2 %224 }
  0x64   :  { %v234_v59 = vmul.f32 %v1570_v45, %v204_v53 }
  0x6b   :  { %v1576_v52 = vpop.permute.xlu2 %229 }
  0x6c   :  { %v235_v60 = vmul.f32 %v1576_v52, %v203_v54 }
  0x6e   :  { %v237_v0 = vpack.c.bf16 %v235_v60, %v234_v59 }
  0x7a   :  { %v1550_v29 = vpop.permute.xlu0 %214 }
  0x7b   :  { %v1552_v30 = vpop.permute.xlu1 %66  ;;  %v232_v43 = vmul.f32 %v1550_v29, %v206_v37  ;;  %v1263_v37 = vld [vmem:[%s1759_s3 + $0x48] sm:$0xff] }
  0x7c   :  { %v84_v44 = vmul.f32 %v1552_v30, %v59_v38  ;;  %v1264_v38 = vld [vmem:[%s1759_s3 + $0x50] sm:$0xff] }
  0x82   :  { %v1564_v41 = vpop.permute.xlu0 %219 }
  0x83   :  { %v1566_v42 = vpop.permute.xlu1 %71  ;;  %v233_v46 = vmul.f32 %v1564_v41, %v205_v39 }
  0x84   :  { %v85_v47 = vmul.f32 %v1566_v42, %v58_v40 }
  0x85   :  { %v236_v49 = vpack.c.bf16 %v233_v46, %v232_v43 }
  0x86   :  { %v88_v48 = vpack.c.bf16 %v85_v47, %v84_v44 }
  0x87   :  { %1170 = vmatmul.msk.bf16.vlgmr.msra.gmra.mxu2 %vm123_vm0, %v236_v49 }
  0x88   :  { %1130 = vmatmul.msk.bf16.vlgmr.msra.gmra.mxu0 %vm123_vm0, %v88_v48 }
  0x8a   :  { %v1582_v55 = vpop.permute.xlu0 %76 }
  0x8b   :  { %v1586_v57 = vpop.permute.xlu1 %81  ;;  %v86_v61 = vmul.f32 %v1582_v55, %v57_v56 }
  0x8c   :  { %v87_v62 = vmul.f32 %v1586_v57, %v56_v58 }
  0x8e   :  { %v89_v63 = vpack.c.bf16 %v87_v62, %v86_v61 }
  0x96   :  { %v188_v7 = vpop.f32.mrf.mxu1 }
  0x97   :  { %1171 = vmatmul.msk.bf16.gmra.mxu2 %vm123_vm0, %v237_v0 }
  0x98   :  { %1131 = vmatmul.msk.bf16.gmra.mxu0 %vm123_vm0, %v89_v63 }
  0x9e   :  { %v190_v19 = vpop.f32.mrf.mxu1 }
  0xa6   :  { %v193_v32 = vpop.f32.mrf.mxu1 }
  0xae   :  { %v195_v44 = vpop.f32.mrf.mxu1 }
 0x105   :  { %v139_v10 = vpop.f32.mrf.mxu0 }
 0x106   :  { %v189_v13 = vadd.f32 %v188_v7, %v139_v10 }
 0x10a   :  { %v286_v15 = vpop.f32.mrf.mxu2 }
 0x10b   :  { %v296_v16 = vadd.f32 %v286_v15, %v189_v13 }
 0x10d   :  { %v141_v20 = vpop.f32.mrf.mxu0  ;;  %v302_v21 = vadd.f32 %v1416_v14, %v296_v16 }
 0x10e   :  { %v191_v22 = vadd.f32 %v190_v19, %v141_v20  ;;  %v1367_v20 = vld [vmem:[#allocation2 + $0xd8] sm:$0xff] }
 0x10f   :  { %532 = vrot.lane.b32.xlu2 %v302_v21, %s1474_s20  ;;  %v306_v33 = vmax.f32 %v302_v21, 0.0  ;;  %669 = vmatpush.bf16.msrb.mxu3 %v1367_v20  ;;  %v1366_v21 = vld [vmem:[#allocation2 + $0xd0] sm:$0xff] }
 0x111   :  { %v321_v56 = vrot.slane %v306_v33, 7  ;;  %v442_v58 = vrot.slane %v306_v33, 6 }
 0x112   :  { %v288_v23 = vpop.f32.mrf.mxu2 }
 0x113   :  { %v297_v24 = vadd.f32 %v288_v23, %v191_v22  ;;  %670 = vmatpush.bf16.msrb.mxu3 %v1366_v21  ;;  %v1365_v22 = vld [vmem:[#allocation2 + $0xc8] sm:$0xff]  ;;  %v1364_v23 = vld [vmem:[#allocation2 + $0xc0] sm:$0xff] }
 0x115   :  { %v144_v25 = vpop.f32.mrf.mxu0  ;;  %v303_v31 = vadd.f32 %v1416_v14, %v297_v24  ;;  %v1371_v24 = vld [vmem:[#allocation2 + $0xf8] sm:$0xff] }
 0x116   :  { %v194_v39 = vadd.f32 %v193_v32, %v144_v25  ;;  %v1375_v25 = vld [vmem:[#allocation2 + $0x118] sm:$0xff]  ;;  %620 = vmatpush.bf16.msrb.mxu2 %v1371_v24 }
 0x117   :  { %534 = vrot.lane.b32.xlu0 %v303_v31, %s1474_s20  ;;  %v307_v34 = vmax.f32 %v303_v31, 0.0  ;;  %700 = vperm.xlu2 %1415, %v1262_v26   ;;  %v1370_v26 = vld [vmem:[#allocation2 + $0xf0] sm:$0xff] }
 0x118   :  { %671 = vmatpush.bf16.msrb.mxu3 %v1365_v22  ;;  %767 = vmatpush.bf16.msra.mxu0 %v1375_v25  ;;  %v1374_v31 = vld [vmem:[#allocation2 + $0x110] sm:$0xff] }
 0x119   :  { %v310_v35 = vpack.c.bf16 %v307_v34, %v306_v33  ;;  %v322_v50 = vrot.slane %v307_v34, 7  ;;  %v443_v53 = vrot.slane %v307_v34, 6 }
 0x11a   :  { %v291_v36 = vpop.f32.mrf.mxu2  ;;  %621 = vmatpush.bf16.msrb.mxu2 %v1370_v26 }
 0x11b   :  { %1206 = vmatmul.msk.bf16.vlgmr.msrb.gmra.mxu0 %vm123_vm0, %v310_v35  ;;  %v298_v43 = vadd.f32 %v291_v36, %v194_v39  ;;  %v327_v61 = vsel %vm55_vm2, %v321_v56, %v322_v50  ;;  %v448_v1 = vsel %vm202_vm1, %v442_v58, %v443_v53  ;;  %v1417_v35 = vld [vmem:[%s1758_s2 + $0x1] ss:$0 sm:$0xff]  ;;  %v1369_v36 = vld [vmem:[#allocation2 + $0xe8] sm:$0xff] }
 0x11c   :  { %v330_v5 = vmul.f32 %v327_v61, %v1566_v42  ;;  %v451_v7 = vmul.f32 %v448_v1, %v1564_v41  ;;  %672 = vmatpush.bf16.msrb.mxu3 %v1364_v23  ;;  %768 = vmatpush.bf16.msra.mxu0 %v1374_v31 }
 0x11d   :  { %v146_v40 = vpop.f32.mrf.mxu0  ;;  %v304_v48 = vadd.f32 %v1416_v14, %v298_v43  ;;  %v1368_v43 = vld [vmem:[#allocation2 + $0xe0] sm:$0xff] }
 0x11e   :  { %v196_v46 = vadd.f32 %v195_v44, %v146_v40  ;;  %622 = vmatpush.bf16.msrb.mxu2 %v1369_v36  ;;  %v1372_v44 = vld [vmem:[#allocation2 + $0x100] sm:$0xff] }
 0x11f   :  { %705 = vperm.xlu0 %1413, %v1263_v37   ;;  %710 = vperm.xlu2 %1415, %v1264_v38   ;;  %v308_v59 = vmax.f32 %v304_v48, 0.0  ;;  %v1373_v37 = vld [vmem:[#allocation2 + $0x108] sm:$0xff] }
 0x120   :  { %769 = vmatpush.bf16.msra.mxu0 %v1373_v37 }
 0x121   :  { %v323_v10 = vrot.slane %v308_v59, 7  ;;  %v444_v11 = vrot.slane %v308_v59, 6 }
 0x122   :  { %v293_v47 = vpop.f32.mrf.mxu2  ;;  %623 = vmatpush.bf16.msrb.mxu2 %v1368_v43 }
 0x123   :  { %v299_v49 = vadd.f32 %v293_v47, %v196_v46  ;;  %v326_v42 = vsel %vm55_vm2, %v322_v50, %v323_v10  ;;  %v447_v13 = vsel %vm202_vm1, %v443_v53, %v444_v11 }
 0x124   :  { %v331_v16 = vmul.f32 %v326_v42, %v1582_v55  ;;  %v452_v17 = vmul.f32 %v447_v13, %v1570_v45  ;;  %770 = vmatpush.bf16.msra.mxu0 %v1372_v44 }
 0x125   :  { %v305_v54 = vadd.f32 %v1416_v14, %v299_v49 }
 0x127   :  { %538 = vrot.lane.b32.xlu1 %v305_v54, %s1474_s20  ;;  %v309_v60 = vmax.f32 %v305_v54, 0.0  ;;  %715 = vperm.xlu0 %1413, %v1265_v51  }
 0x129   :  { %v324_v62 = vrot.slane %v309_v60, 7  ;;  %v445_v63 = vrot.slane %v309_v60, 6  ;;  %v311_v0 = vpack.c.bf16 %v309_v60, %v308_v59 }
 0x12b   :  { %1207 = vmatmul.msk.bf16.gmra.mxu0 %vm123_vm0, %v311_v0  ;;  %v328_v2 = vsel %vm55_vm2, %v324_v62, %v321_v56  ;;  %v449_v3 = vsel %vm202_vm1, %v445_v63, %v442_v58  ;;  %v325_v12 = vsel %vm55_vm2, %v323_v10, %v324_v62 }
 0x12c   :  { %v329_v4 = vmul.f32 %v328_v2, %v1552_v30  ;;  %v450_v6 = vmul.f32 %v449_v3, %v1550_v29  ;;  %v446_v30 = vsel %vm202_vm1, %v444_v11, %v445_v63  ;;  %v332_v14 = vmul.f32 %v325_v12, %v1586_v57 }
 0x12d   :  { %v453_v15 = vmul.f32 %v446_v30, %v1576_v52 }
 0x12e   :  { %v333_v8 = vpack.c.bf16 %v330_v5, %v329_v4  ;;  %v454_v9 = vpack.c.bf16 %v451_v7, %v450_v6  ;;  %v334_v18 = vpack.c.bf16 %v332_v14, %v331_v16 }
 0x12f   :  { %536 = vrot.lane.b32.xlu1 %v304_v48, %s1474_s20  ;;  %v455_v19 = vpack.c.bf16 %v453_v15, %v452_v17 }
 0x130   :  { %1188 = vmatmul.msk.bf16.vlgmr.msra.gmra.mxu3 %vm123_vm0, %v333_v8  ;;  %1224 = vmatmul.msk.bf16.vlgmr.msrb.gmra.mxu1 %vm123_vm0, %v454_v9 }
 0x140   :  { %1189 = vmatmul.msk.bf16.gmra.mxu3 %vm123_vm0, %v334_v18  ;;  %1225 = vmatmul.msk.bf16.gmra.mxu1 %vm123_vm0, %v455_v19 }
 0x169   :  { %v533_v51 = vpop.permute.xlu2 %532 }
 0x171   :  { %v1672_v24 = vpop.permute.xlu2 %700 }
 0x189   :  { %v535_v54 = vpop.permute.xlu0 %534 }
 0x191   :  { %v1674_v25 = vpop.permute.xlu0 %705 }
 0x198   :  { %v432_v57 = vpop.f32.mrf.mxu0 }
 0x199   :  { %v539_v2 = vpop.permute.xlu1 %538  ;;  %v1693_v43 = vpop.permute.xlu0 %715 }
 0x1a0   :  { %v434_v38 = vpop.f32.mrf.mxu0 }
 0x1a1   :  { %v537_v12 = vpop.permute.xlu1 %536 }
 0x1a8   :  { %v437_v53 = vpop.f32.mrf.mxu0 }
 0x1ad   :  { %v504_v55 = vpop.f32.mrf.mxu1 }
 0x1b0   :  { %v439_v5 = vpop.f32.mrf.mxu0 }
 0x1b3   :  { %v383_v32 = vpop.f32.mrf.mxu3 }
 0x1b4   :  { %v433_v33 = vadd.f32 %v432_v57, %v383_v32 }
 0x1b5   :  { %v506_v39 = vpop.f32.mrf.mxu1 }
 0x1b6   :  { %v514_v34 = vadd.f32 %v504_v55, %v433_v33 }
 0x1b8   :  { %v520_v40 = vadd.f32 %v1417_v35, %v514_v34 }
 0x1ba   :  { %v524_v48 = vmax.f32 %v520_v40, 0.0 }
 0x1bb   :  { %v385_v46 = vpop.f32.mrf.mxu3 }
 0x1bc   :  { %v435_v47 = vadd.f32 %v434_v38, %v385_v46  ;;  %v544_v56 = vadd.f32 %v533_v51, %v524_v48 }
 0x1bd   :  { %v509_v59 = vpop.f32.mrf.mxu1 }
 0x1be   :  { %v515_v49 = vadd.f32 %v506_v39, %v435_v47  ;;  %v1648_v63 = vmax.f32 %v544_v56, 0.0  ;;  %v1379_v56 = vld [vmem:[#allocation2 + $0x138] sm:$0xff] }
 0x1bf   :  { %913 = vmatpush.bf16.msra.mxu2 %v1379_v56 }
 0x1c0   :  { %v521_v50 = vadd.f32 %v1417_v35, %v515_v49  ;;  %v563_v16 = vrot.slane %v1648_v63, 6  ;;  %v684_v17 = vrot.slane %v1648_v63, 4  ;;  %v1701_v49 = vpop.permute.xlu2 %710 }
 0x1c2   :  { %v525_v58 = vmax.f32 %v521_v50, 0.0 }
 0x1c3   :  { %v388_v60 = vpop.f32.mrf.mxu3 }
 0x1c4   :  { %v545_v61 = vadd.f32 %v535_v54, %v525_v58  ;;  %v438_v62 = vadd.f32 %v437_v53, %v388_v60  ;;  %v1378_v58 = vld [vmem:[#allocation2 + $0x130] sm:$0xff]  ;;  %v1376_v60 = vld [vmem:[#allocation2 + $0x120] sm:$0xff] }
 0x1c5   :  { %v511_v8 = vpop.f32.mrf.mxu1  ;;  %914 = vmatpush.bf16.msra.mxu2 %v1378_v58 }
 0x1c6   :  { %v1650_v0 = vmax.f32 %v545_v61, 0.0  ;;  %v516_v1 = vadd.f32 %v509_v59, %v438_v62  ;;  %v1377_v59 = vld [vmem:[#allocation2 + $0x128] sm:$0xff]  ;;  %v1383_v61 = vld [vmem:[#allocation2 + $0x158] sm:$0xff] }
 0x1c7   :  { %v1387_v62 = vld [vmem:[#allocation2 + $0x178] sm:$0xff]  ;;  %864 = vmatpush.bf16.msra.mxu1 %v1383_v61 }
 0x1c8   :  { %v552_v3 = vpack.c.bf16 %v1650_v0, %v1648_v63  ;;  %v522_v4 = vadd.f32 %v1417_v35, %v516_v1  ;;  %v564_v13 = vrot.slane %v1650_v0, 6  ;;  %v685_v14 = vrot.slane %v1650_v0, 4  ;;  %985 = vmatpush.bf16.msra.mxu3 %v1387_v62 }
 0x1c9   :  { %915 = vmatpush.bf16.msra.mxu2 %v1377_v59 }
 0x1ca   :  { %1260 = vmatmul.msk.bf16.vlgmr.msrb.gmra.mxu3 %vm123_vm0, %v552_v3  ;;  %v526_v9 = vmax.f32 %v522_v4, 0.0  ;;  %v569_v20 = vsel %vm202_vm1, %v563_v16, %v564_v13  ;;  %v691_v57 = vsel %vm688_vm3, %v684_v17, %v685_v14  ;;  %v1386_v3 = vld [vmem:[#allocation2 + $0x170] sm:$0xff] }
 0x1cb   :  { %v390_v6 = vpop.f32.mrf.mxu3  ;;  %v572_v32 = vmul.f32 %v569_v20, %v1564_v41  ;;  %v719_v34 = vmul.f32 %v1674_v25, %v691_v57 }
 0x1cc   :  { %v440_v7 = vadd.f32 %v439_v5, %v390_v6  ;;  %v546_v30 = vadd.f32 %v537_v12, %v526_v9  ;;  %986 = vmatpush.bf16.msra.mxu3 %v1386_v3  ;;  %v1381_v5 = vld [vmem:[#allocation2 + $0x148] sm:$0xff]  ;;  %v1380_v9 = vld [vmem:[#allocation2 + $0x140] sm:$0xff] }
 0x1cd   :  { %916 = vmatpush.bf16.msra.mxu2 %v1376_v60  ;;  %v1385_v6 = vld [vmem:[#allocation2 + $0x168] sm:$0xff] }
 0x1ce   :  { %v517_v10 = vadd.f32 %v511_v8, %v440_v7  ;;  %v1660_v18 = vmax.f32 %v546_v30, 0.0 }
 0x1d0   :  { %v523_v11 = vadd.f32 %v1417_v35, %v517_v10  ;;  %v565_v37 = vrot.slane %v1660_v18, 6  ;;  %v686_v38 = vrot.slane %v1660_v18, 4  ;;  %987 = vmatpush.bf16.msra.mxu3 %v1385_v6  ;;  %v1384_v10 = vld [vmem:[#allocation2 + $0x160] sm:$0xff] }
 0x1d2   :  { %v527_v42 = vmax.f32 %v523_v11, 0.0  ;;  %v568_v44 = vsel %vm202_vm1, %v564_v13, %v565_v37  ;;  %v690_v46 = vsel %vm688_vm3, %v685_v14, %v686_v38 }
 0x1d3   :  { %v573_v50 = vmul.f32 %v568_v44, %v1570_v45  ;;  %v720_v51 = vmul.f32 %v1701_v49, %v690_v46 }
 0x1d4   :  { %v547_v15 = vadd.f32 %v539_v2, %v527_v42  ;;  %v1382_v2 = vld [vmem:[#allocation2 + $0x150] sm:$0xff]  ;;  %988 = vmatpush.bf16.msra.mxu3 %v1384_v10  ;;  %v1418_v42 = vld [vmem:[%s1758_s2 + $0x2] ss:$0 sm:$0xff] }
 0x1d5   :  { %865 = vmatpush.bf16.msra.mxu1 %v1382_v2 }
 0x1d6   :  { %v1662_v19 = vmax.f32 %v547_v15, 0.0 }
 0x1d8   :  { %v687_v21 = vrot.slane %v1662_v19, 4  ;;  %v553_v22 = vpack.c.bf16 %v1662_v19, %v1660_v18  ;;  %v566_v23 = vrot.slane %v1662_v19, 6 }
 0x1d9   :  { %866 = vmatpush.bf16.msra.mxu1 %v1381_v5 }
 0x1da   :  { %1261 = vmatmul.msk.bf16.gmra.mxu3 %vm123_vm0, %v553_v22  ;;  %v570_v55 = vsel %vm202_vm1, %v566_v23, %v563_v16  ;;  %v692_v26 = vsel %vm688_vm3, %v687_v21, %v684_v17  ;;  %v567_v39 = vsel %vm202_vm1, %v565_v37, %v566_v23  ;;  %v689_v40 = vsel %vm688_vm3, %v686_v38, %v687_v21 }
 0x1db   :  { %v571_v31 = vmul.f32 %v570_v55, %v1550_v29  ;;  %v718_v33 = vmul.f32 %v1672_v24, %v692_v26  ;;  %v574_v47 = vmul.f32 %v567_v39, %v1576_v52  ;;  %v721_v48 = vmul.f32 %v1693_v43, %v689_v40 }
 0x1dd   :  { %v575_v35 = vpack.c.bf16 %v572_v32, %v571_v31  ;;  %v722_v36 = vpack.c.bf16 %v719_v34, %v718_v33  ;;  %v576_v53 = vpack.c.bf16 %v574_v47, %v573_v50  ;;  %v723_v54 = vpack.c.bf16 %v721_v48, %v720_v51  ;;  %867 = vmatpush.bf16.msra.mxu1 %v1380_v9 }
 0x1df   :  { %1242 = vmatmul.msk.bf16.vlgmr.msrb.gmra.mxu2 %vm123_vm0, %v575_v35  ;;  %1282 = vmatmul.msk.bf16.vlgmr.msra.gmra.mxu0 %vm123_vm0, %v722_v36 }
 0x1ef   :  { %1243 = vmatmul.msk.bf16.gmra.mxu2 %vm123_vm0, %v576_v53  ;;  %1283 = vmatmul.msk.bf16.gmra.mxu0 %vm123_vm0, %v723_v54 }
 0x24d   :  { %v674_v1 = vpop.f32.mrf.mxu3 }
 0x255   :  { %v676_v11 = vpop.f32.mrf.mxu3 }
 0x25c   :  { %v772_v4 = vpop.f32.mrf.mxu0 }
 0x25d   :  { %v679_v20 = vpop.f32.mrf.mxu3 }
 0x262   :  { %v625_v7 = vpop.f32.mrf.mxu2 }
 0x263   :  { %v675_v8 = vadd.f32 %v674_v1, %v625_v7 }
 0x264   :  { %v774_v12 = vpop.f32.mrf.mxu0 }
 0x265   :  { %v782_v30 = vadd.f32 %v772_v4, %v675_v8  ;;  %v681_v32 = vpop.f32.mrf.mxu3 }
 0x267   :  { %v788_v15 = vadd.f32 %v1418_v42, %v782_v30 }
 0x269   :  { %v792_v21 = vmax.f32 %v788_v15, 0.0 }
 0x26a   :  { %v627_v13 = vpop.f32.mrf.mxu2 }
 0x26b   :  { %v677_v14 = vadd.f32 %v676_v11, %v627_v13  ;;  %v807_v44 = vrot.slane %v792_v21, 6  ;;  %v928_v46 = vrot.slane %v792_v21, 4 }
 0x26c   :  { %v777_v23 = vpop.f32.mrf.mxu0 }
 0x26d   :  { %v783_v16 = vadd.f32 %v774_v12, %v677_v14 }
 0x26f   :  { %v789_v17 = vadd.f32 %v1418_v42, %v783_v16 }
 0x271   :  { %v793_v22 = vmax.f32 %v789_v17, 0.0  ;;  %v1405_v17 = vld [vmem:[#allocation2 + $0x190] sm:$0xff]  }
 0x272   :  { %v630_v57 = vpop.f32.mrf.mxu2 }
 0x273   :  { %v796_v55 = vpack.c.bf16 %v793_v22, %v792_v21  ;;  %v680_v26 = vadd.f32 %v679_v20, %v630_v57  ;;  %v808_v38 = vrot.slane %v793_v22, 6  ;;  %v929_v39 = vrot.slane %v793_v22, 4  ;;  %v1404_v21 = vld [vmem:[#allocation2 + $0x188] sm:$0xff]  }
 0x274   :  { %v779_v35 = vpop.f32.mrf.mxu0  ;;  %v1398_v22 = vunpack.c.l.bf16 %v1405_v17 }
 0x275   :  { %1318 = vmatmul.msk.bf16.vlgmr.msra.gmra.mxu2 %vm123_vm0, %v796_v55  ;;  %v784_v31 = vadd.f32 %v777_v23, %v680_v26  ;;  %v813_v50 = vsel %vm202_vm1, %v807_v44, %v808_v38  ;;  %v934_v51 = vsel %vm688_vm3, %v928_v46, %v929_v39  ;;  %v1395_v55 = vunpack.c.h.bf16 %v1404_v21  ;;  %v1389_v26 = vld [vmem:[#allocation2 + $0x180] sm:$0xff]  }
 0x276   :  { %v816_v61 = vmul.f32 %v813_v50, %v1564_v41  ;;  %v937_v1 = vmul.f32 %v934_v51, %v1674_v25 }
 0x277   :  { %v790_v36 = vadd.f32 %v1418_v42, %v784_v31 }
 0x279   :  { %v794_v47 = vmax.f32 %v790_v36, 0.0  ;;  %v1419_v36 = vld [vmem:[%s1758_s2 + $0x3] ss:$0 sm:$0xff] }
 0x27a   :  { %v632_v33 = vpop.f32.mrf.mxu2 }
 0x27b   :  { %v682_v34 = vadd.f32 %v681_v32, %v632_v33  ;;  %v809_v4 = vrot.slane %v794_v47, 6  ;;  %v930_v5 = vrot.slane %v794_v47, 4  ;;  %v1394_v33 = vunpack.c.l.bf16 %v1404_v21 }
 0x27d   :  { %v785_v37 = vadd.f32 %v779_v35, %v682_v34  ;;  %v812_v41 = vsel %vm202_vm1, %v808_v38, %v809_v4  ;;  %v1391_v38 = vunpack.c.h.bf16 %v1389_v26 }
 0x27e   :  { %v817_v8 = vmul.f32 %v812_v41, %v1570_v45  ;;  %v1477_v41 = vmov 0.0  }
 0x27f   :  { %v791_v40 = vadd.f32 %v1418_v42, %v785_v37 }
 0x281   :  { %v795_v48 = vmax.f32 %v791_v40, 0.0 }
 0x283   :  { %v810_v53 = vrot.slane %v795_v48, 6  ;;  %v931_v54 = vrot.slane %v795_v48, 4  ;;  %v797_v56 = vpack.c.bf16 %v795_v48, %v794_v47  ;;  %v1390_v47 = vunpack.c.l.bf16 %v1389_v26 }
 0x285   :  { %v814_v58 = vsel %vm202_vm1, %v810_v53, %v807_v44  ;;  %v935_v59 = vsel %vm688_vm3, %v931_v54, %v928_v46  ;;  %1319 = vmatmul.msk.bf16.gmra.mxu2 %vm123_vm0, %v797_v56  ;;  %v811_v6 = vsel %vm202_vm1, %v809_v4, %v810_v53  ;;  %v1024_v53 = vmul.u32 16, %v1548_v28 }
 0x286   :  { %v815_v60 = vmul.f32 %v814_v58, %v1550_v29  ;;  %v936_v62 = vmul.f32 %v935_v59, %v1672_v24  ;;  %v932_v29 = vsel %vm688_vm3, %v930_v5, %v931_v54  ;;  %v933_v24 = vsel %vm688_vm3, %v929_v39, %v930_v5 }
 0x287   :  { %v818_v25 = vmul.f32 %v811_v6, %v1576_v52  ;;  %v939_v7 = vmul.f32 %v932_v29, %v1693_v43  ;;  %v938_v9 = vmul.f32 %v933_v24, %v1701_v49  ;;  %v1406_v52 = vld [vmem:[#allocation2 + $0x198] sm:$0xff]   ;;  %v1399_v49 = vunpack.c.h.bf16 %v1405_v17 }
 0x288   :  { %v819_v2 = vpack.c.bf16 %v816_v61, %v815_v60  ;;  %v940_v3 = vpack.c.bf16 %v937_v1, %v936_v62  ;;  %v1403_v43 = vunpack.c.h.bf16 %v1406_v52  ;;  %v1402_v20 = vunpack.c.l.bf16 %v1406_v52 }
 0x289   :  { %v820_v10 = vpack.c.bf16 %v818_v25, %v817_v8  ;;  %v941_v11 = vpack.c.bf16 %v939_v7, %v938_v9  ;;  %v1023_v61 = vand.u32 127, %v53_v27  ;;  %v1026_v62 = vadd.s32 16, %v1024_v53 }
 0x28a   :  { %1300 = vmatmul.msk.bf16.vlgmr.msra.gmra.mxu1 %vm123_vm0, %v819_v2  ;;  %1336 = vmatmul.msk.bf16.vlgmr.msra.gmra.mxu3 %vm123_vm0, %v940_v3 }
 0x28b   :  { %1084 = vmatpush.msrb.mxu1 %v1403_v43  ;;  %vm1025_vm4 = vcmp.ge.s32.totalorder %v1023_v61, %v1024_v53  ;;  %vm1027_vm5 = vcmp.lt.s32.totalorder %v1023_v61, %v1026_v62 }
 0x28c   :  { %vm1028_vm6 = vmand %vm1025_vm4, %vm1027_vm5 }
 0x28d   :  { %1085 = vmatpush.msrb.mxu1 %v1402_v20  ;;  %v1029_v24 = vsel %vm1028_vm6, 0.0625, %v1477_v41 }
 0x28f   :  { %1086 = vmatpush.msrb.mxu1 %v1399_v49 }
 0x291   :  { %1087 = vmatpush.msrb.mxu1 %v1398_v22 }
 0x293   :  { %1088 = vmatpush.msrb.mxu1 %v1395_v55 }
 0x295   :  { %1089 = vmatpush.msrb.mxu1 %v1394_v33 }
 0x297   :  { %1090 = vmatpush.msrb.mxu1 %v1391_v38 }
 0x299   :  { %1091 = vmatpush.msrb.mxu1 %v1390_v47 }
 0x29a   :  { %1301 = vmatmul.msk.bf16.gmra.mxu1 %vm123_vm0, %v820_v10  ;;  %1337 = vmatmul.msk.bf16.gmra.mxu3 %vm123_vm0, %v941_v11 }
 0x2f8   :  { %v918_v12 = vpop.f32.mrf.mxu2 }
 0x300   :  { %v920_v13 = vpop.f32.mrf.mxu2 }
 0x307   :  { %v869_v30 = vpop.f32.mrf.mxu1 }
 0x308   :  { %v923_v45 = vpop.f32.mrf.mxu2  ;;  %v919_v35 = vadd.f32 %v918_v12, %v869_v30 }
 0x30d   :  { %v990_v42 = vpop.f32.mrf.mxu3 }
 0x30e   :  { %v1000_v40 = vadd.f32 %v990_v42, %v919_v35 }
 0x30f   :  { %v871_v14 = vpop.f32.mrf.mxu1 }
 0x310   :  { %v921_v31 = vadd.f32 %v920_v13, %v871_v14  ;;  %v925_v39 = vpop.f32.mrf.mxu2  ;;  %v1006_v54 = vadd.f32 %v1419_v36, %v1000_v40 }
 0x312   :  { %v1010_v1 = vmax.f32 %v1006_v54, 0.0 }
 0x314   :  { %v1014_v6 = vadd.f32 %v1010_v1, %v1648_v63 }
 0x315   :  { %v992_v15 = vpop.f32.mrf.mxu3 }
 0x316   :  { %v1001_v37 = vadd.f32 %v992_v15, %v921_v31  ;;  %v1018_v27 = vmax.f32 %v1014_v6, 0.0 }
 0x317   :  { %v874_v16 = vpop.f32.mrf.mxu1 }
 0x318   :  { %v924_v57 = vadd.f32 %v923_v45, %v874_v16  ;;  %v1007_v50 = vadd.f32 %v1419_v36, %v1001_v37 }
 0x31a   :  { %v1011_v59 = vmax.f32 %v1007_v50, 0.0 }
 0x31c   :  { %v1015_v5 = vadd.f32 %v1011_v59, %v1650_v0  ;;  %v1420_v0 = vld [vmem:[%s1758_s2 + $0x4] ss:$0 sm:$0xff] }
 0x31d   :  { %v995_v23 = vpop.f32.mrf.mxu3 }
 0x31e   :  { %v1002_v32 = vadd.f32 %v995_v23, %v924_v57  ;;  %v1019_v29 = vmax.f32 %v1015_v5, 0.0 }
 0x31f   :  { %v876_v34 = vpop.f32.mrf.mxu1 }
 0x320   :  { %v1008_v44 = vadd.f32 %v1419_v36, %v1002_v32  ;;  %v926_v46 = vadd.f32 %v925_v39, %v876_v34 }
 0x322   :  { %v1012_v56 = vmax.f32 %v1008_v44, 0.0 }
 0x324   :  { %v1016_v3 = vadd.f32 %v1012_v56, %v1660_v18 }
 0x325   :  { %v997_v48 = vpop.f32.mrf.mxu3 }
 0x326   :  { %v1003_v51 = vadd.f32 %v997_v48, %v926_v46  ;;  %v1020_v28 = vmax.f32 %v1016_v3, 0.0 }
 0x328   :  { %v1009_v58 = vadd.f32 %v1419_v36, %v1003_v51 }
 0x32a   :  { %v1013_v60 = vmax.f32 %v1009_v58, 0.0 }
 0x32c   :  { %v1017_v2 = vadd.f32 %v1013_v60, %v1662_v19 }
 0x32e   :  { %v1021_v4 = vmax.f32 %v1017_v2, 0.0 }
 0x330   :  { %1046 = vmatpush.msrb.mxu0 %v1021_v4 }
 0x332   :  { %1047 = vmatpush.msrb.mxu0 %v1020_v28 }
 0x334   :  { %1048 = vmatpush.msrb.mxu0 %v1019_v29 }
 0x336   :  { %1049 = vmatpush.msrb.mxu0 %v1018_v27 }
 0x337   :  { %1338 = vmatmul.msk.f32.vlgmr.msrb.gmra.mxu0 %vm1030_vm7, %v1029_v24 }
 0x3b4   :  { %v1051_v18 = vpop.f32.mrf.mxu0 }
 0x3b5   :  { %1339 = vmatmul.msk.f32.vlgmr.msrb.gmra.mxu1 %vm123_vm0, %v1051_v18 }
 0x432   :  { %v1093_v63 = vpop.f32.mrf.mxu1 }
 0x433   :  { %v1094_v19 = vadd.f32 %v1420_v0, %v1093_v63 }
 0x435   :  { %1096 = vst [vmem:[#allocation5] sm:$0x3] %v1094_v19 }
 0x436   :  { %1107 = dma.vmem_to_hbm [thread:$0]  %s1103_s9, 32, %s1105_s12, [#allocation4]  }
 0x437   :  { %1471 = dma.done.wait [#allocation4], 32  }
 0x438   :  { %1472 = vsyncadd [#allocation4], 4294967264 }
 0x439   :  { %1112 = vsyncpa [#allocation3], 1 }
 0x43a   :  { %1113 = vsyncpa [#allocation4], 1 }

</bundles_post_ra>
